<compile_context>
chip_gen: v7x
topology: tpu7x:2x2x1
jax: 0.10.0
libtpu: 0.0.40
codegen_flags: <defaults>
</compile_context>

<pallas_src>
import functools

import jax
import jax.numpy as jnp
from jax.experimental import pallas as pl
from jax.experimental.pallas import tpu as pltpu

EMBEDDING_SIZE = 32
N_HEADS = 4
HEAD_SIZE = 8
CONTEXT = 8
BATCH = 2


def attention_kernel(x_ref, wqkv_ref, wo_ref, bo_ref, o_ref, *, batch, seq, masking):
    """Multi-head self-attention + output projection; all batches & heads at once.

    x_ref    : (B*T, E)      flattened tokens
    wqkv_ref : (E, 3*H*D)    fused, Q-prescaled projection weight (x @ W layout)
    wo_ref   : (H*D, E)      output projection weight
    bo_ref   : (1, E)        output projection bias
    o_ref    : (B*T, E)
    """
    D = HEAD_SIZE
    hd = N_HEADS * HEAD_SIZE

    x = x_ref[...]                                                        # (B*T, E)
    # One fused MXU push computes (pre-scaled) Q, K and V together.
    qkv = jnp.dot(x, wqkv_ref[...], preferred_element_type=jnp.float32)  # (B*T, 3*H*D)

    def split_heads(base):
        # (B*T, H*D) columns at `base` -> (H*B, T, D).  Heads must move from the
        # lane axis to a leading batch axis; static per-head lane slices plus a
        # leading-axis concatenate is the lowering-safe way to do that (the
        # reshape only splits the sublane axis at an 8-row tile boundary).
        parts = [qkv[:, base + h * D: base + (h + 1) * D].reshape(batch, seq, D)
                 for h in range(N_HEADS)]
        return jnp.concatenate(parts, axis=0)                             # z = h*B + b

    qz = split_heads(0)          # (H*B, T, D), already scaled by D**-0.5
    kz = split_heads(hd)
    vz = split_heads(2 * hd)

    # All heads & batches in one batched contraction (no explicit K transpose).
    s = jnp.einsum("zqd,zkd->zqk", qz, kz,
                   preferred_element_type=jnp.float32)                    # (H*B, T, T)

    if masking:
        # (T, T) mask built once from 2-D iotas; broadcast over Z for free.
        row = jax.lax.broadcasted_iota(jnp.int32, (seq, seq), 0)
        col = jax.lax.broadcasted_iota(jnp.int32, (seq, seq), 1)
        allowed = (col <= row)[None, :, :]
        # Large finite negative (not -inf): NaN-safe even for fully-masked rows.
        s = jnp.where(allowed, s, jnp.float32(-1e30))

    # Single softmax over all heads; normalization deferred to the PV output.
    s = s - jnp.max(s, axis=-1, keepdims=True)
    p = jnp.exp(s)
    denom = jnp.sum(p, axis=-1, keepdims=True)                            # (H*B, T, 1)

    oh = jnp.einsum("zqk,zkd->zqd", p, vz,
                    preferred_element_type=jnp.float32)                   # (H*B, T, D)
    # Apply the softmax denominator on the D-wide side (T/D fewer multiplies),
    # using the EUP approximate reciprocal instead of a VALU divide.
    oh = oh * pl.reciprocal(denom, approx=True)

    # Re-pack heads onto the lane axis and run the output projection as ONE
    # matmul: the (h, d) contraction accumulates inside the MXU (no per-head
    # dots + VPU accumulator adds).
    heads = jnp.concatenate(
        [oh[h * batch:(h + 1) * batch].reshape(batch * seq, D)
         for h in range(N_HEADS)],
        axis=1)                                                           # (B*T, H*D)
    o_ref[...] = (jnp.dot(heads, wo_ref[...],
                          preferred_element_type=jnp.float32) + bo_ref[...])


def prepare_params(params):
    """One-time parameter fusion — call at init, NOT per forward.

    Folds the 1/sqrt(head_size) score scale into the Q columns and fuses the
    three projection weights into a single (E, 3*H*D) matrix.
    """
    wq, wk, wv, wo, bo = params
    wqkv = jnp.concatenate([wq * HEAD_SIZE ** (-0.5), wk, wv], axis=1)
    return wqkv, wo, bo


@functools.partial(jax.jit, static_argnames=("masking",))
def causal_self_attention(x, fused_params, *, masking=False):
    """Pallas forward pass of CausalSelfAttention (self-attention path).

    fused_params = prepare_params((wq, wk, wv, wo, bo)) in "x @ W" layout.
    """
    wqkv, wo, bo = fused_params
    B, T, E = x.shape
    out_dim = wo.shape[1]            # proj output size (== EMBEDDING_SIZE)
    x2d = x.reshape(B * T, E)        # collapse batch: single gridless call

    kernel = functools.partial(attention_kernel, batch=B, seq=T, masking=masking)
    vmem = pl.BlockSpec(memory_space=pltpu.MemorySpace.VMEM)

    out2d = pl.pallas_call(
        kernel,
        out_shape=jax.ShapeDtypeStruct((B * T, out_dim), jnp.float32),
        in_specs=[vmem, vmem, vmem, vmem],
        out_specs=vmem,
    )(x2d, wqkv, wo, bo)
    return out2d.reshape(B, T, out_dim)


def reference_attention(x, params, masking=False):
    """Pure-JAX mirror of the PyTorch forward (dropout = identity)."""
    wq, wk, wv, wo, bo = params
    B, T, _ = x.shape
    q = (x @ wq).reshape(B, T, N_HEADS, HEAD_SIZE).transpose(0, 2, 1, 3)
    k = (x @ wk).reshape(B, T, N_HEADS, HEAD_SIZE).transpose(0, 2, 1, 3)
    v = (x @ wv).reshape(B, T, N_HEADS, HEAD_SIZE).transpose(0, 2, 1, 3)
    wei = jnp.einsum("bhqd,bhkd->bhqk", q, k) * HEAD_SIZE ** (-0.5)
    if masking:
        tril = jnp.tril(jnp.ones((T, T), dtype=bool))
        wei = jnp.where(tril[None, None, :, :], wei, -jnp.inf)
    wei = jax.nn.softmax(wei, axis=-1)
    out = jnp.einsum("bhqk,bhkd->bhqd", wei, v)
    out = out.transpose(0, 2, 1, 3).reshape(B, T, N_HEADS * HEAD_SIZE)
    return out @ wo + bo


if __name__ == "__main__":
    key = jax.random.PRNGKey(0)
    keys = jax.random.split(key, 8)
    E, HD = EMBEDDING_SIZE, N_HEADS * HEAD_SIZE

    x = jax.random.normal(keys[0], (BATCH, CONTEXT, E), dtype=jnp.float32)

    def init(k, shape, scale=0.1):
        return scale * jax.random.normal(k, shape, dtype=jnp.float32)

    params = (
        init(keys[1], (E, HD)),   # wq  (x @ W layout == torch weight.T)
        init(keys[2], (E, HD)),   # wk
        init(keys[3], (E, HD)),   # wv
        init(keys[4], (HD, E)),   # wo  (proj weight)
        init(keys[5], (1, E)),    # bo  (proj bias)
    )
    fused = prepare_params(params)   # one-time fusion (outside the jitted forward)

    # Check both the module's default (masking=False) and the causal path.
    for masking in (False, True):
        out = causal_self_attention(x, fused, masking=masking)
        out = jax.block_until_ready(out)
        ref = reference_attention(x, params, masking=masking)
        assert out.shape == (BATCH, CONTEXT, EMBEDDING_SIZE)
        # Tolerance accounts for the EUP approximate reciprocal in softmax.
        assert jnp.allclose(out, ref, atol=2e-3, rtol=2e-3), (
            f"mismatch vs reference (masking={masking})")

    print("KERNEL_OK")
</pallas_src>

<mosaic_0001>
module attributes {stable_mosaic.version = 11 : i64} {
  func.func @attention_kernel(%arg0: memref<16x32xf32, #tpu.memory_space<vmem>>, %arg1: memref<32x96xf32, #tpu.memory_space<vmem>>, %arg2: memref<32x32xf32, #tpu.memory_space<vmem>>, %arg3: memref<1x32xf32, #tpu.memory_space<vmem>>, %arg4: memref<16x32xf32, #tpu.memory_space<vmem>>) attributes {dimension_semantics = [], scalar_prefetch = 0 : i64, scratch_operands = 0 : i64, tpu.core_type = #tpu.core_type<tc>} {
    %c0 = arith.constant 0 : index
    %c0_0 = arith.constant 0 : index
    %0 = vector.load %arg0[%c0, %c0_0] : memref<16x32xf32, #tpu.memory_space<vmem>>, vector<16x32xf32>
    %c0_1 = arith.constant 0 : index
    %c0_2 = arith.constant 0 : index
    %1 = vector.load %arg1[%c0_1, %c0_2] : memref<32x96xf32, #tpu.memory_space<vmem>>, vector<32x96xf32>
    %cst = arith.constant dense<0.000000e+00> : vector<16x96xf32>
    %2 = tpu.matmul %0, %1, %cst {dimension_numbers = #tpu.dot_dimension_numbers<[1], [0], [0], [1], [0, 0, 1, 1], [], []>} : vector<16x32xf32>, vector<32x96xf32>, vector<16x96xf32> -> vector<16x96xf32>
    %3 = vector.extract_strided_slice %2 {offsets = [0, 0], sizes = [16, 8], strides = [1, 1]} : vector<16x96xf32> to vector<16x8xf32>
    %4 = vector.shape_cast %3 : vector<16x8xf32> to vector<2x8x8xf32>
    %5 = vector.extract_strided_slice %2 {offsets = [0, 8], sizes = [16, 8], strides = [1, 1]} : vector<16x96xf32> to vector<16x8xf32>
    %6 = vector.shape_cast %5 : vector<16x8xf32> to vector<2x8x8xf32>
    %7 = vector.extract_strided_slice %2 {offsets = [0, 16], sizes = [16, 8], strides = [1, 1]} : vector<16x96xf32> to vector<16x8xf32>
    %8 = vector.shape_cast %7 : vector<16x8xf32> to vector<2x8x8xf32>
    %9 = vector.extract_strided_slice %2 {offsets = [0, 24], sizes = [16, 8], strides = [1, 1]} : vector<16x96xf32> to vector<16x8xf32>
    %10 = vector.shape_cast %9 : vector<16x8xf32> to vector<2x8x8xf32>
    %11 = tpu.concatenate %4, %6, %8, %10 in 0 : vector<2x8x8xf32>, vector<2x8x8xf32>, vector<2x8x8xf32>, vector<2x8x8xf32> -> vector<8x8x8xf32>
    %12 = vector.extract_strided_slice %2 {offsets = [0, 32], sizes = [16, 8], strides = [1, 1]} : vector<16x96xf32> to vector<16x8xf32>
    %13 = vector.shape_cast %12 : vector<16x8xf32> to vector<2x8x8xf32>
    %14 = vector.extract_strided_slice %2 {offsets = [0, 40], sizes = [16, 8], strides = [1, 1]} : vector<16x96xf32> to vector<16x8xf32>
    %15 = vector.shape_cast %14 : vector<16x8xf32> to vector<2x8x8xf32>
    %16 = vector.extract_strided_slice %2 {offsets = [0, 48], sizes = [16, 8], strides = [1, 1]} : vector<16x96xf32> to vector<16x8xf32>
    %17 = vector.shape_cast %16 : vector<16x8xf32> to vector<2x8x8xf32>
    %18 = vector.extract_strided_slice %2 {offsets = [0, 56], sizes = [16, 8], strides = [1, 1]} : vector<16x96xf32> to vector<16x8xf32>
    %19 = vector.shape_cast %18 : vector<16x8xf32> to vector<2x8x8xf32>
    %20 = tpu.concatenate %13, %15, %17, %19 in 0 : vector<2x8x8xf32>, vector<2x8x8xf32>, vector<2x8x8xf32>, vector<2x8x8xf32> -> vector<8x8x8xf32>
    %21 = vector.extract_strided_slice %2 {offsets = [0, 64], sizes = [16, 8], strides = [1, 1]} : vector<16x96xf32> to vector<16x8xf32>
    %22 = vector.shape_cast %21 : vector<16x8xf32> to vector<2x8x8xf32>
    %23 = vector.extract_strided_slice %2 {offsets = [0, 72], sizes = [16, 8], strides = [1, 1]} : vector<16x96xf32> to vector<16x8xf32>
    %24 = vector.shape_cast %23 : vector<16x8xf32> to vector<2x8x8xf32>
    %25 = vector.extract_strided_slice %2 {offsets = [0, 80], sizes = [16, 8], strides = [1, 1]} : vector<16x96xf32> to vector<16x8xf32>
    %26 = vector.shape_cast %25 : vector<16x8xf32> to vector<2x8x8xf32>
    %27 = vector.extract_strided_slice %2 {offsets = [0, 88], sizes = [16, 8], strides = [1, 1]} : vector<16x96xf32> to vector<16x8xf32>
    %28 = vector.shape_cast %27 : vector<16x8xf32> to vector<2x8x8xf32>
    %29 = tpu.concatenate %22, %24, %26, %28 in 0 : vector<2x8x8xf32>, vector<2x8x8xf32>, vector<2x8x8xf32>, vector<2x8x8xf32> -> vector<8x8x8xf32>
    "tpu.trace_start"() <{level = 10 : i32, message = "zqd,zkd->zqk"}> : () -> ()
    %cst_3 = arith.constant dense<0.000000e+00> : vector<8x8x8xf32>
    %30 = tpu.matmul %11, %20, %cst_3 {dimension_numbers = #tpu.dot_dimension_numbers<[2], [2], [1], [1], [0, 0, 0, 1, 1, 1], [0], [0]>} : vector<8x8x8xf32>, vector<8x8x8xf32>, vector<8x8x8xf32> -> vector<8x8x8xf32>
    "tpu.trace_stop"() : () -> ()
    %cst_4 = arith.constant dense<0xFF800000> : vector<8x8xf32>
    %31 = vector.multi_reduction <maximumf>, %30, %cst_4 [2] : vector<8x8x8xf32> to vector<8x8xf32>
    %32 = vector.shape_cast %31 : vector<8x8xf32> to vector<8x8x1xf32>
    %33 = vector.broadcast %32 : vector<8x8x1xf32> to vector<8x8x8xf32>
    %34 = arith.subf %30, %33 : vector<8x8x8xf32>
    %35 = math.exp %34 : vector<8x8x8xf32>
    %cst_5 = arith.constant dense<0.000000e+00> : vector<8x8xf32>
    %36 = vector.multi_reduction <add>, %35, %cst_5 [2] : vector<8x8x8xf32> to vector<8x8xf32>
    %37 = vector.shape_cast %36 : vector<8x8xf32> to vector<8x8x1xf32>
    "tpu.trace_start"() <{level = 10 : i32, message = "zqk,zkd->zqd"}> : () -> ()
    %cst_6 = arith.constant dense<0.000000e+00> : vector<8x8x8xf32>
    %38 = tpu.matmul %35, %29, %cst_6 {dimension_numbers = #tpu.dot_dimension_numbers<[2], [1], [1], [2], [0, 0, 0, 1, 1, 2], [0], [0]>} : vector<8x8x8xf32>, vector<8x8x8xf32>, vector<8x8x8xf32> -> vector<8x8x8xf32>
    "tpu.trace_stop"() : () -> ()
    %39 = tpu.reciprocal %37 {approx = true} : vector<8x8x1xf32> -> vector<8x8x1xf32>
    %40 = vector.broadcast %39 : vector<8x8x1xf32> to vector<8x8x8xf32>
    %41 = arith.mulf %38, %40 : vector<8x8x8xf32>
    %42 = vector.extract_strided_slice %41 {offsets = [0, 0, 0], sizes = [2, 8, 8], strides = [1, 1, 1]} : vector<8x8x8xf32> to vector<2x8x8xf32>
    %43 = vector.shape_cast %42 : vector<2x8x8xf32> to vector<16x8xf32>
    %44 = vector.extract_strided_slice %41 {offsets = [2, 0, 0], sizes = [2, 8, 8], strides = [1, 1, 1]} : vector<8x8x8xf32> to vector<2x8x8xf32>
    %45 = vector.shape_cast %44 : vector<2x8x8xf32> to vector<16x8xf32>
    %46 = vector.extract_strided_slice %41 {offsets = [4, 0, 0], sizes = [2, 8, 8], strides = [1, 1, 1]} : vector<8x8x8xf32> to vector<2x8x8xf32>
    %47 = vector.shape_cast %46 : vector<2x8x8xf32> to vector<16x8xf32>
    %48 = vector.extract_strided_slice %41 {offsets = [6, 0, 0], sizes = [2, 8, 8], strides = [1, 1, 1]} : vector<8x8x8xf32> to vector<2x8x8xf32>
    %49 = vector.shape_cast %48 : vector<2x8x8xf32> to vector<16x8xf32>
    %50 = tpu.concatenate %43, %45, %47, %49 in 1 : vector<16x8xf32>, vector<16x8xf32>, vector<16x8xf32>, vector<16x8xf32> -> vector<16x32xf32>
    %c0_7 = arith.constant 0 : index
    %c0_8 = arith.constant 0 : index
    %51 = vector.load %arg2[%c0_7, %c0_8] : memref<32x32xf32, #tpu.memory_space<vmem>>, vector<32x32xf32>
    %cst_9 = arith.constant dense<0.000000e+00> : vector<16x32xf32>
    %52 = tpu.matmul %50, %51, %cst_9 {dimension_numbers = #tpu.dot_dimension_numbers<[1], [0], [0], [1], [0, 0, 1, 1], [], []>} : vector<16x32xf32>, vector<32x32xf32>, vector<16x32xf32> -> vector<16x32xf32>
    %c0_10 = arith.constant 0 : index
    %c0_11 = arith.constant 0 : index
    %53 = vector.load %arg3[%c0_10, %c0_11] : memref<1x32xf32, #tpu.memory_space<vmem>>, vector<1x32xf32>
    %54 = vector.broadcast %53 : vector<1x32xf32> to vector<16x32xf32>
    %55 = arith.addf %52, %54 : vector<16x32xf32>
    %c0_12 = arith.constant 0 : index
    %c0_13 = arith.constant 0 : index
    %56 = vector.load %arg4[%c0_12, %c0_13] : memref<16x32xf32, #tpu.memory_space<vmem>>, vector<16x32xf32>
    tpu.vector_store %arg4[%c0_12, %c0_13], %55 {strides = array<i32>} : memref<16x32xf32, #tpu.memory_space<vmem>>, vector<16x32xf32>,
    return
  }
}

</mosaic_0001>

<bundles_post_ra>
// kernel: causal_self_attention.1
= control target key start
LH: loop header
LB: loop body
LE: loop exit
PB: predicated region body
PF: predicated region fallthrough
CT: control target
= control target key end

     0   :  { %9 = vsyncpa [#allocation3], 0  ;;  %s2182_s0 = inlined_call_operand.hbm [shape: f32[16,32], index: 0, kind: input, shape index: {}]   ;;  %s2183_s1 = inlined_call_operand.hbm [shape: f32[32,96], index: 1, kind: input, shape index: {}]   ;;  %s2184_s2 = inlined_call_operand.hbm [shape: f32[32,32], index: 2, kind: input, shape index: {}]   ;;  %s2185_s3 = inlined_call_operand.vmem [shape: f32[1,32], index: 3, kind: input, shape index: {}]   ;;  %s2186_s4 = inlined_call_operand.hbm [shape: f32[16,32], index: 4, kind: output, shape index: {}]  }
   0x1   :  { %10 = vsyncpa [#allocation6], 0 }
   0x2   :  { %11 = vsyncpa [#allocation4], 0  ;;  %s1942_s15 = smov [#allocation5]   ;;  %s1943_s17 = smov [#allocation2]  }
   0x3   :  { %s29_s16 = sshll.u32 %s1942_s15, 4  ;;  %s17_s18 = sshll.u32 %s1943_s17, 4  ;;  %s30_s16 = int_to_ptr.vmem [resolvable:$true] %s29_s16  ;;  %s1982_s18 = int_to_ptr.vmem [resolvable:$true] %s17_s18 }
   0x4   :  { %s1848_s21 = scalar_lea.hbm %s2183_s1, 512 }
   0x5   :  { %p1849_p0 = scmp.ne.s32.totalorder %s2183_s1, %s1848_s21  ;;  %p1852_p1 = scmp.lt.u32.totalorder %s1848_s21, %s2183_s1 }
   0x7   :  { %p1854_p2 = pnand %p1852_p1, %p1849_p0 }
   0x9   :  { %1857 = shalt.err (!%p1854_p2)
}
   0xa   :  { %s1858_s26 = scalar_lea.vmem %s30_s16, 512  ;;  %p1863_p4 = scmp.lt.s32.totalorder %s30_s16, %s30_s16 }
   0xb   :  { %p1859_p3 = scmp.ne.s32.totalorder %s30_s16, %s1858_s26  ;;  %p1864_p5 = scmp.lt.s32.totalorder %s1858_s26, %s1858_s26 }
   0xd   :  { %p1865_p6 = por %p1864_p5, %p1863_p4 }
   0xf   :  { %p1866_p7 = pnand %p1865_p6, %p1859_p3 }
  0x11   :  { %1869 = shalt.err (!%p1866_p7)
}
  0x12   :  { %s1944_s27 = smov 128   ;;  %s1945_s28 = smov 8  }
  0x13   :  { %35 = dma.hbm_to_vmem [thread:$0]  %s2183_s1, 512, %s30_s16, [#allocation6], %s1944_s27, %s1944_s27, %s1945_s28  }
  0x14   :  { %s1870_s7 = scalar_lea.hbm %s2182_s0, 256 }
  0x15   :  { %p1871_p8 = scmp.ne.s32.totalorder %s2182_s0, %s1870_s7  ;;  %p1874_p9 = scmp.lt.u32.totalorder %s1870_s7, %s2182_s0 }
  0x17   :  { %p1876_p10 = pnand %p1874_p9, %p1871_p8 }
  0x19   :  { %1879 = shalt.err (!%p1876_p10)
}
  0x1a   :  { %s1880_s12 = scalar_lea.vmem %s1982_s18, 256  ;;  %p1885_p12 = scmp.lt.s32.totalorder %s1982_s18, %s1982_s18 }
  0x1b   :  { %p1881_p11 = scmp.ne.s32.totalorder %s1982_s18, %s1880_s12  ;;  %p1886_p13 = scmp.lt.s32.totalorder %s1880_s12, %s1880_s12 }
  0x1d   :  { %p1887_p0 = por %p1886_p13, %p1885_p12 }
  0x1f   :  { %p1888_p1 = pnand %p1887_p0, %p1881_p11 }
  0x21   :  { %1891 = shalt.err (!%p1888_p1)
}
  0x22   :  { %23 = dma.hbm_to_vmem [thread:$0]  %s2182_s0, 256, %s1982_s18, [#allocation3], %s1944_s27, %s1944_s27, %s1945_s28  }
  0x23   :  { %s1946_s14 = smov [#allocation7]   ;;  %s1892_s19 = scalar_lea.hbm %s2184_s2, 512 }
  0x24   :  { %s41_s15 = sshll.u32 %s1946_s14, 4  ;;  %p1893_p2 = scmp.ne.s32.totalorder %s2184_s2, %s1892_s19  ;;  %s42_s15 = int_to_ptr.vmem [resolvable:$true] %s41_s15 }
  0x25   :  { %p1896_p3 = scmp.lt.u32.totalorder %s1892_s19, %s2184_s2 }
  0x27   :  { %p1898_p4 = pnand %p1896_p3, %p1893_p2 }
  0x29   :  { %1901 = shalt.err (!%p1898_p4)
}
  0x2a   :  { %s1902_s24 = scalar_lea.vmem %s42_s15, 512  ;;  %p1907_p6 = scmp.lt.s32.totalorder %s42_s15, %s42_s15 }
  0x2b   :  { %p1903_p5 = scmp.ne.s32.totalorder %s42_s15, %s1902_s24  ;;  %p1908_p7 = scmp.lt.s32.totalorder %s1902_s24, %s1902_s24 }
  0x2d   :  { %p1909_p8 = por %p1908_p7, %p1907_p6 }
  0x2f   :  { %p1910_p9 = pnand %p1909_p8, %p1903_p5 }
  0x31   :  { %1913 = shalt.err (!%p1910_p9)
}
  0x32   :  { %47 = dma.hbm_to_vmem [thread:$0]  %s2184_s2, 512, %s42_s15, [#allocation6], %s1944_s27, %s1944_s27, %s1945_s28  }
  0x33   :  { %1936 = dma.done.wait [#allocation3], 256  }
  0x34   :  { %1937 = vsyncadd [#allocation3], 4294967040 }
  0x35   :  { %1938 = dma.done.wait [#allocation6], 1024  }
  0x36   :  { %1939 = vsyncadd [#allocation6], 4294966272  ;;  %vm65_vm0 = vcmask 261120   ;;  %v61_v0 = vld [vmem:[#allocation5] sm:$0xff]  ;;  %v62_v1 = vld [vmem:[#allocation5 + $0x8] sm:$0xff]  ;;  %v1947_v8 = vmov 0.0  }
  0x37   :  { %v63_v2 = vld [vmem:[#allocation5 + $0x10] sm:$0xff]  ;;  %v1785_v3 = vpack.c.bf16 %v62_v1, %v61_v0  ;;  %v64_v4 = vld [vmem:[#allocation5 + $0x18] sm:$0xff]  ;;  %1694 = vmatprep.subr.mxu1 %v1947_v8  ;;  %s1948_s2 = smov 112   ;;  %s1949_s25 = smov 120   ;;  %vm1950_vm1 = vmmov 0   ;;  %vm163_vm2 = vcmask 64512  }
  0x38   :  { %v59_v5 = vld [vmem:[#allocation2] sm:$0xff]  ;;  %v1789_v6 = vpack.c.bf16 %v64_v4, %v63_v2  ;;  %v60_v7 = vld [vmem:[#allocation2 + $0x8] sm:$0xff]  ;;  %1696 = vmatprep.mubr.msk.f32.mxu1 %vm1950_vm1, %v1947_v8  ;;  %s1951_s26 = smov 104   ;;  %s1952_s29 = smov 96   ;;  %vm1492_vm3 = vcmask 130048   ;;  %vm1495_vm4 = vcmask 195584  }
  0x39   :  { %1691 = vmatprep.mubr.msk.f32.mxu0 %vm65_vm0, %v59_v5  ;;  %1786 = vmatprep.subr.bf16.mxu0 %v1785_v3  ;;  %s1953_s30 = smov 64   ;;  %s1954_s5 = smov 16  }
  0x3a   :  { %1788 = vmatpush3.bf16.msra.mxu0 %v1785_v3  ;;  %s1955_s6 = smov 24   ;;  %s1956_s9 = smov [#allocation8]  }
  0x3b   :  { %1790 = vmatprep.subr.bf16.mxu0 %v1789_v6  ;;  %s1597_s10 = sshll.u32 %s1956_s9, 4  ;;  %s1598_s10 = int_to_ptr.vmem [resolvable:$true] %s1597_s10 }
  0x3c   :  { %s1914_s11 = scalar_lea.vmem %s1598_s10, 256  ;;  %p1919_p11 = scmp.lt.s32.totalorder %s1598_s10, %s1598_s10 }
  0x3d   :  { %p1915_p10 = scmp.ne.s32.totalorder %s1598_s10, %s1914_s11  ;;  %p1920_p12 = scmp.lt.s32.totalorder %s1914_s11, %s1914_s11 }
  0x3e   :  { %1792 = vmatpush3.bf16.msra.mxu0 %v1789_v6 }
  0x3f   :  { %1714 = vmatprep.subr.mxu0 %v1947_v8  ;;  %p1921_p13 = por %p1920_p12, %p1919_p11 }
  0x41   :  { %1692 = vmatmul.mubr.msk.f32.vlgmr.msra.gmra.mrb[0].mxu0 %vm65_vm0, %v60_v7  ;;  %p1922_p0 = pnand %p1921_p13, %p1915_p10 }
  0x42   :  { %1716 = vmatprep.mubr.msk.f32.mxu0 %vm1950_vm1, %v1947_v8 }
 0x114   :  { %v1693_v9 = vpop.f32.mrb[0].mxu0 }
 0x115   :  { %v138_v10 = vpop.f32.mrb[1].mxu0 }
 0x116   :  { %153 = vrot.lane.b32.xlu1 %v138_v10, %s1948_s2  ;;  %149 = vrot.lane.b32.xlu0 %v138_v10, %s1949_s25 }
 0x11a   :  { %155 = vrot.lane.b32.xlu1 %v1693_v9, %s1948_s2  ;;  %151 = vrot.lane.b32.xlu0 %v1693_v9, %s1949_s25 }
 0x11e   :  { %159 = vrot.lane.b32.xlu1 %v1693_v9, %s1951_s26  ;;  %157 = vrot.lane.b32.xlu0 %v138_v10, %s1951_s26 }
 0x122   :  { %238 = vrot.lane.b32.xlu1 %v1693_v9, %s1952_s29  ;;  %161 = vrot.lane.b32.xlu0 %v138_v10, %s1952_s29 }
 0x188   :  { %v154_v11 = vpop.permute.xlu1 %153  ;;  %v150_v12 = vpop.permute.xlu0 %149 }
 0x189   :  { %314 = vrot.lane.b32.xlu0 %v150_v12, %s1952_s29 }
 0x18c   :  { %v152_v13 = vpop.permute.xlu0 %151  ;;  %v156_v14 = vpop.permute.xlu1 %155 }
 0x18d   :  { %466 = vrot.lane.b32.xlu0 %v154_v11, %s1952_s29  ;;  %390 = vrot.lane.b32.xlu1 %v152_v13, %s1952_s29 }
 0x190   :  { %v2042_v15 = vpop.permute.xlu0 %157  ;;  %v2045_v16 = vpop.permute.xlu1 %159 }
 0x191   :  { %542 = vrot.lane.b32.xlu1 %v156_v14, %s1952_s29  ;;  %618 = vrot.lane.b32.xlu0 %v2042_v15, %s1952_s29 }
 0x194   :  { %v162_v17 = vpop.permute.xlu0 %161  ;;  %v239_v18 = vpop.permute.xlu1 %238 }
 0x195   :  { %694 = vrot.lane.b32.xlu1 %v2045_v16, %s1952_s29  ;;  %918 = vrot.lane.b32.xlu0 %v1693_v9, %s1953_s30 }
 0x196   :  { %1695 = vmatpush3.xpose.msk.msra.mxu1 %vm163_vm2, %v162_v17 }
 0x197   :  { %1699 = vmatprep.subr.mxu1 %v1947_v8 }
 0x199   :  { %1697 = vmatmul.mubr.msk.f32.vlgmr.msra.gmra.mrb[0].mxu1 %vm163_vm2, %v138_v10  ;;  %842 = vrot.lane.b32.xlu1 %v138_v10, %s1953_s30 }
 0x19a   :  { %1146 = vrot.lane.b32.xlu0 %v154_v11, %s1953_s30  ;;  %1700 = vmatpush3.xpose.msk.msra.mxu1 %vm163_vm2, %v239_v18 }
 0x19b   :  { %1701 = vmatprep.mubr.msk.f32.mxu1 %vm1950_vm1, %v1947_v8  ;;  %1704 = vmatprep.subr.mxu1 %v1947_v8 }
 0x19d   :  { %1702 = vmatmul.mubr.msk.f32.vlgmr.msra.gmra.mrb[2].mxu1 %vm163_vm2, %v1693_v9  ;;  %1070 = vrot.lane.b32.xlu1 %v152_v13, %s1953_s30 }
 0x19e   :  { %1706 = vmatprep.mubr.msk.f32.mxu1 %vm1950_vm1, %v1947_v8 }
 0x1a1   :  { %1222 = vrot.lane.b32.xlu1 %v156_v14, %s1953_s30 }
 0x1a5   :  { %994 = vrot.lane.b32.xlu1 %v150_v12, %s1953_s30 }
 0x1fb   :  { %v315_v19 = vpop.permute.xlu0 %314 }
 0x1fc   :  { %1705 = vmatpush3.xpose.msk.msra.mxu1 %vm163_vm2, %v315_v19 }
 0x1fd   :  { %1709 = vmatprep.subr.mxu1 %v1947_v8 }
 0x1ff   :  { %v391_v20 = vpop.permute.xlu1 %390  ;;  %1707 = vmatmul.mubr.msk.f32.vlgmr.msra.gmra.mrb[4].mxu1 %vm163_vm2, %v150_v12  ;;  %v467_v21 = vpop.permute.xlu0 %466 }
 0x200   :  { %1710 = vmatpush3.xpose.msk.msra.mxu1 %vm163_vm2, %v391_v20  ;;  %1715 = vmatpush3.xpose.msk.msra.mxu0 %vm163_vm2, %v467_v21 }
 0x201   :  { %1711 = vmatprep.mubr.msk.f32.mxu1 %vm1950_vm1, %v1947_v8  ;;  %1719 = vmatprep.subr.mxu1 %v1947_v8 }
 0x202   :  { %1724 = vmatprep.subr.mxu0 %v1947_v8 }
 0x203   :  { %v543_v22 = vpop.permute.xlu1 %542  ;;  %1712 = vmatmul.mubr.msk.f32.vlgmr.msra.gmra.mrb[6].mxu1 %vm163_vm2, %v152_v13  ;;  %1717 = vmatmul.mubr.msk.f32.vlgmr.msra.gmra.mrb[2].mxu0 %vm163_vm2, %v154_v11  ;;  %v619_v23 = vpop.permute.xlu0 %618 }
 0x204   :  { %1720 = vmatpush3.xpose.msk.msra.mxu1 %vm163_vm2, %v543_v22  ;;  %1725 = vmatpush3.xpose.msk.msra.mxu0 %vm163_vm2, %v619_v23 }
 0x205   :  { %1721 = vmatprep.mubr.msk.f32.mxu1 %vm1950_vm1, %v1947_v8  ;;  %1726 = vmatprep.mubr.msk.f32.mxu0 %vm1950_vm1, %v1947_v8 }
 0x206   :  { %1729 = vmatprep.subr.mxu1 %v1947_v8  ;;  %1734 = vmatprep.subr.mxu0 %v1947_v8 }
 0x207   :  { %v695_v24 = vpop.permute.xlu1 %694  ;;  %1722 = vmatmul.mubr.msk.f32.vlgmr.msra.gmra.mrb[8].mxu1 %vm163_vm2, %v156_v14  ;;  %1727 = vmatmul.mubr.msk.f32.vlgmr.msra.gmra.mrb[4].mxu0 %vm163_vm2, %v2042_v15  ;;  %v919_v25 = vpop.permute.xlu0 %918 }
 0x208   :  { %1730 = vmatpush3.xpose.msk.msra.mxu1 %vm163_vm2, %v695_v24  ;;  %1731 = vmatprep.mubr.msk.f32.mxu1 %vm1950_vm1, %v1947_v8 }
 0x209   :  { %1739 = vmatprep.subr.mxu1 %v1947_v8  ;;  %1736 = vmatprep.mubr.msk.f32.mxu0 %vm1950_vm1, %v1947_v8 }
 0x20b   :  { %v843_v26 = vpop.permute.xlu1 %842  ;;  %1732 = vmatmul.mubr.msk.f32.vlgmr.msra.gmra.mrb[10].mxu1 %vm163_vm2, %v2045_v16 }
 0x20c   :  { %1735 = vmatpush3.msra.mxu0 %v843_v26  ;;  %1740 = vmatpush3.msra.mxu1 %v919_v25  ;;  %v1147_v53 = vpop.permute.xlu0 %1146 }
 0x20d   :  { %1744 = vmatprep.subr.mxu0 %v1947_v8  ;;  %1741 = vmatprep.mubr.msk.f32.mxu1 %vm1950_vm1, %v1947_v8 }
 0x20e   :  { %1749 = vmatprep.subr.mxu1 %v1947_v8 }
 0x20f   :  { %v1071_v51 = vpop.permute.xlu1 %1070 }
 0x213   :  { %v1223_v52 = vpop.permute.xlu1 %1222 }
 0x217   :  { %v995_v54 = vpop.permute.xlu1 %994 }
 0x26c   :  { %v234_v27 = vpop.f32.mrb[0].mxu1 }
 0x26d   :  { %v1698_v28 = vpop.f32.mrb[1].mxu1  ;;  %v770_v29 = vsel %vm163_vm2, %v234_v27, -inf }
 0x26e   :  { %771 = vmax.xlane.f32.xlu0 %v770_v29 }
 0x270   :  { %v310_v30 = vpop.f32.mrb[2].mxu1 }
 0x271   :  { %v1703_v31 = vpop.f32.mrb[3].mxu1  ;;  %v773_v32 = vsel %vm163_vm2, %v310_v30, -inf }
 0x272   :  { %774 = vmax.xlane.f32.xlu1 %v773_v32 }
 0x2d2   :  { %v386_v33 = vpop.f32.mrb[4].mxu1 }
 0x2d3   :  { %v1708_v34 = vpop.f32.mrb[5].mxu1  ;;  %v776_v35 = vsel %vm163_vm2, %v386_v33, -inf }
 0x2d4   :  { %777 = vmax.xlane.f32.xlu0 %v776_v35 }
 0x2d6   :  { %v462_v36 = vpop.f32.mrb[6].mxu1  ;;  %v538_v37 = vpop.f32.mrb[2].mxu0 }
 0x2d7   :  { %v1713_v38 = vpop.f32.mrb[7].mxu1  ;;  %v1718_v39 = vpop.f32.mrb[3].mxu0  ;;  %v779_v40 = vsel %vm163_vm2, %v462_v36, -inf  ;;  %v782_v41 = vsel %vm163_vm2, %v538_v37, -inf }
 0x2d8   :  { %780 = vmax.xlane.f32.xlu0 %v779_v40  ;;  %783 = vmax.xlane.f32.xlu1 %v782_v41  ;;  %v1498_v41 = vld [vmem:[#allocation7] sm:$0xff] }
 0x2da   :  { %v614_v42 = vpop.f32.mrb[8].mxu1  ;;  %v690_v43 = vpop.f32.mrb[4].mxu0 }
 0x2db   :  { %v1723_v44 = vpop.f32.mrb[9].mxu1  ;;  %v1728_v45 = vpop.f32.mrb[5].mxu0  ;;  %v785_v46 = vsel %vm163_vm2, %v614_v42, -inf  ;;  %v788_v47 = vsel %vm163_vm2, %v690_v43, -inf }
 0x2dc   :  { %786 = vmax.xlane.f32.xlu0 %v785_v46  ;;  %789 = vmax.xlane.f32.xlu1 %v788_v47  ;;  %v1500_v45 = vld [vmem:[#allocation7 + $0x10] sm:$0xff]  ;;  %v1501_v46 = vld [vmem:[#allocation7 + $0x18] sm:$0xff] }
 0x2dd   :  { %v1797_v47 = vpack.c.bf16 %v1501_v46, %v1500_v45 }
 0x2de   :  { %v766_v48 = vpop.f32.mrb[10].mxu1 }
 0x2df   :  { %v1733_v49 = vpop.f32.mrb[11].mxu1  ;;  %v791_v50 = vsel %vm163_vm2, %v766_v48, -inf }
 0x2e0   :  { %792 = vmax.xlane.f32.xlu0 %v791_v50 }
 0x2ed   :  { %1374 = vrot.lane.b32.xlu1 %v2045_v16, %s1953_s30 }
 0x2f6   :  { %1298 = vrot.lane.b32.xlu0 %v2042_v15, %s1953_s30 }
 0x2fb   :  { %v772_v55 = vpop.xlane.xlu0 %771 }
 0x2fc   :  { %v794_v56 = vsub.f32 %v234_v27, %v772_v55 }
 0x2fe   :  { %v802_v57 = vmul.f32 1.442695, %v794_v56 }
 0x2ff   :  { %v775_v58 = vpop.xlane.xlu1 %774 }
 0x300   :  { %1816 = vpow2.f32 %v802_v57  ;;  %v795_v59 = vsub.f32 %v310_v30, %v775_v58 }
 0x302   :  { %v804_v60 = vmul.f32 1.442695, %v795_v59 }
 0x304   :  { %1818 = vpow2.f32 %v804_v60 }
 0x30a   :  { %v2110_v61 = vpop.eup %1816 }
 0x30b   :  { %1737 = vmatmul.mubr.msk.f32.vlgmr.msra.gmra.mrb[6].mxu0 %vm163_vm2, %v2110_v61  ;;  %v818_v32 = vsel %vm163_vm2, %v2110_v61, 0.0 }
 0x30c   :  { %1745 = vmatpush3.msra.mxu0 %v995_v54  ;;  %1746 = vmatprep.mubr.msk.f32.mxu0 %vm1950_vm1, %v1947_v8 }
 0x30d   :  { %1754 = vmatprep.subr.mxu0 %v1947_v8 }
 0x30e   :  { %v2117_v62 = vpop.eup %1818 }
 0x30f   :  { %1742 = vmatmul.mubr.msk.f32.vlgmr.msra.gmra.mrb[12].mxu1 %vm163_vm2, %v2117_v62 }
 0x310   :  { %1750 = vmatpush3.msra.mxu1 %v1071_v51  ;;  %1751 = vmatprep.mubr.msk.f32.mxu1 %vm1950_vm1, %v1947_v8 }
 0x311   :  { %1759 = vmatprep.subr.mxu1 %v1947_v8 }
 0x361   :  { %v778_v63 = vpop.xlane.xlu0 %777 }
 0x362   :  { %v796_v0 = vsub.f32 %v386_v33, %v778_v63  ;;  %v821_v33 = vsel %vm163_vm2, %v2117_v62, 0.0 }
 0x364   :  { %v806_v1 = vmul.f32 1.442695, %v796_v0 }
 0x365   :  { %v784_v2 = vpop.xlane.xlu1 %783  ;;  %v781_v3 = vpop.xlane.xlu0 %780 }
 0x366   :  { %1820 = vpow2.f32 %v806_v1  ;;  %v798_v4 = vsub.f32 %v538_v37, %v784_v2  ;;  %v797_v5 = vsub.f32 %v462_v36, %v781_v3 }
 0x368   :  { %v810_v6 = vmul.f32 1.442695, %v798_v4  ;;  %v808_v7 = vmul.f32 1.442695, %v797_v5 }
 0x369   :  { %v790_v9 = vpop.xlane.xlu1 %789  ;;  %v787_v10 = vpop.xlane.xlu0 %786 }
 0x36a   :  { %1822 = vpow2.f32 %v810_v6  ;;  %v800_v11 = vsub.f32 %v690_v43, %v790_v9  ;;  %v799_v12 = vsub.f32 %v614_v42, %v787_v10  ;;  %v1499_v42 = vld [vmem:[#allocation7 + $0x8] sm:$0xff] }
 0x36b   :  { %1824 = vpow2.f32 %v808_v7  ;;  %v1793_v43 = vpack.c.bf16 %v1499_v42, %v1498_v41 }
 0x36c   :  { %v814_v13 = vmul.f32 1.442695, %v800_v11  ;;  %v812_v14 = vmul.f32 1.442695, %v799_v12 }
 0x36d   :  { %v793_v15 = vpop.xlane.xlu0 %792  ;;  %v1375_v28 = vpop.permute.xlu1 %1374 }
 0x36e   :  { %1826 = vpow2.f32 %v814_v13  ;;  %v801_v16 = vsub.f32 %v766_v48, %v793_v15 }
 0x36f   :  { %1828 = vpow2.f32 %v812_v14 }
 0x370   :  { %v1821_v17 = vpop.eup %1820  ;;  %v816_v18 = vmul.f32 1.442695, %v801_v16 }
 0x371   :  { %1747 = vmatmul.mubr.msk.f32.vlgmr.msra.gmra.mrb[8].mxu0 %vm163_vm2, %v1821_v17  ;;  %v824_v19 = vsel %vm163_vm2, %v1821_v17, 0.0  ;;  %v1299_v22 = vpop.permute.xlu0 %1298 }
 0x372   :  { %1830 = vpow2.f32 %v816_v18  ;;  %1755 = vmatpush3.msra.mxu0 %v1147_v53  ;;  %825 = vadd.xlane.f32.xlu0 %v824_v19 }
 0x373   :  { %1756 = vmatprep.mubr.msk.f32.mxu0 %vm1950_vm1, %v1947_v8  ;;  %1764 = vmatprep.subr.mxu0 %v1947_v8 }
 0x374   :  { %v1823_v20 = vpop.eup %1822 }
 0x375   :  { %v1825_v21 = vpop.eup %1824  ;;  %1757 = vmatmul.mubr.msk.f32.vlgmr.msra.gmra.mrb[10].mxu0 %vm163_vm2, %v1823_v20  ;;  %v830_v23 = vsel %vm163_vm2, %v1823_v20, 0.0 }
 0x376   :  { %1752 = vmatmul.mubr.msk.f32.vlgmr.msra.gmra.mrb[14].mxu1 %vm163_vm2, %v1825_v21  ;;  %1765 = vmatpush3.msra.mxu0 %v1299_v22  ;;  %v827_v24 = vsel %vm163_vm2, %v1825_v21, 0.0 }
 0x377   :  { %1760 = vmatpush3.msra.mxu1 %v1223_v52  ;;  %831 = vadd.xlane.f32.xlu0 %v830_v23 }
 0x378   :  { %v1827_v25 = vpop.eup %1826  ;;  %828 = vadd.xlane.f32.xlu1 %v827_v24  ;;  %1761 = vmatprep.mubr.msk.f32.mxu1 %vm1950_vm1, %v1947_v8 }
 0x379   :  { %v1829_v26 = vpop.eup %1828  ;;  %1766 = vmatprep.mubr.msk.f32.mxu0 %vm1950_vm1, %v1947_v8  ;;  %1769 = vmatprep.subr.mxu1 %v1947_v8  ;;  %v836_v27 = vsel %vm163_vm2, %v1827_v25, 0.0 }
 0x37a   :  { %1762 = vmatmul.mubr.msk.f32.vlgmr.msra.gmra.mrb[16].mxu1 %vm163_vm2, %v1829_v26  ;;  %1767 = vmatmul.mubr.msk.f32.vlgmr.msra.gmra.mrb[12].mxu0 %vm163_vm2, %v1827_v25  ;;  %v833_v29 = vsel %vm163_vm2, %v1829_v26, 0.0 }
 0x37b   :  { %1770 = vmatpush3.msra.mxu1 %v1375_v28  ;;  %834 = vadd.xlane.f32.xlu0 %v833_v29  ;;  %v1636_v28 = vld [vmem:[%s2185_s3] ss:$0 sm:$0xff] }
 0x37c   :  { %v1831_v30 = vpop.eup %1830  ;;  %837 = vadd.xlane.f32.xlu1 %v836_v27  ;;  %1771 = vmatprep.mubr.msk.f32.mxu1 %vm1950_vm1, %v1947_v8 }
 0x37d   :  { %v839_v31 = vsel %vm163_vm2, %v1831_v30, 0.0  ;;  %1794 = vmatprep.subr.bf16.mxu0 %v1793_v43 }
 0x37e   :  { %1772 = vmatmul.mubr.msk.f32.vlgmr.msra.gmra.mrb[18].mxu1 %vm163_vm2, %v1831_v30  ;;  %1796 = vmatpush3.bf16.msra.mxu0 %v1793_v43 }
 0x37f   :  { %840 = vadd.xlane.f32.xlu0 %v839_v31  ;;  %1798 = vmatprep.subr.bf16.mxu0 %v1797_v47 }
 0x380   :  { %819 = vadd.xlane.f32.xlu1 %v818_v32 }
 0x382   :  { %1800 = vmatpush3.bf16.msra.mxu0 %v1797_v47 }
 0x383   :  { %822 = vadd.xlane.f32.xlu0 %v821_v33 }
 0x3de   :  { %v2150_v34 = vpop.f32.mrb[6].mxu0 }
 0x3df   :  { %v1738_v35 = vpop.f32.mrb[7].mxu0 }
 0x3e2   :  { %v2152_v36 = vpop.f32.mrb[12].mxu1 }
 0x3e3   :  { %v1743_v37 = vpop.f32.mrb[13].mxu1 }
 0x3ff   :  { %v826_v8 = vpop.xlane.xlu0 %825 }
 0x400   :  { %1832 = vrcp.f32 %v826_v8 }
 0x404   :  { %v832_v38 = vpop.xlane.xlu0 %831 }
 0x405   :  { %v829_v39 = vpop.xlane.xlu1 %828  ;;  %1834 = vrcp.f32 %v832_v38 }
 0x406   :  { %1836 = vrcp.f32 %v829_v39 }
 0x408   :  { %v835_v40 = vpop.xlane.xlu0 %834 }
 0x409   :  { %v838_v44 = vpop.xlane.xlu1 %837  ;;  %1838 = vrcp.f32 %v835_v40 }
 0x40a   :  { %1840 = vrcp.f32 %v838_v44  ;;  %v1833_v48 = vpop.eup %1832 }
 0x40c   :  { %v841_v49 = vpop.xlane.xlu0 %840 }
 0x40d   :  { %1842 = vrcp.f32 %v841_v49  ;;  %v820_v10 = vpop.xlane.xlu1 %819 }
 0x40e   :  { %1844 = vrcp.f32 %v820_v10 }
 0x40f   :  { %v1835_v53 = vpop.eup %1834 }
 0x410   :  { %v1837_v55 = vpop.eup %1836  ;;  %v823_v11 = vpop.xlane.xlu0 %822 }
 0x411   :  { %1846 = vrcp.f32 %v823_v11 }
 0x413   :  { %v1839_v61 = vpop.eup %1838 }
 0x414   :  { %v1841_v62 = vpop.eup %1840 }
 0x417   :  { %v1843_v5 = vpop.eup %1842 }
 0x418   :  { %v1845_v13 = vpop.eup %1844 }
 0x419   :  { %v1458_v16 = vmul.f32 %v1845_v13, %v2150_v34 }
 0x41b   :  { %v1847_v17 = vpop.eup %1846 }
 0x41c   :  { %v1459_v22 = vmul.f32 %v1847_v17, %v2152_v36 }
 0x444   :  { %v1066_v50 = vpop.f32.mrb[8].mxu0 }
 0x445   :  { %v1460_v51 = vmul.f32 %v1833_v48, %v1066_v50  ;;  %v1748_v52 = vpop.f32.mrb[9].mxu0 }
 0x447   :  { %1468 = vrot.lane.b32.xlu1 %v1460_v51, %s1945_s28 }
 0x448   :  { %v1218_v54 = vpop.f32.mrb[10].mxu0 }
 0x449   :  { %v1142_v56 = vpop.f32.mrb[14].mxu1  ;;  %v1462_v57 = vmul.f32 %v1835_v53, %v1218_v54  ;;  %v1758_v58 = vpop.f32.mrb[11].mxu0 }
 0x44a   :  { %v1461_v59 = vmul.f32 %v1837_v55, %v1142_v56  ;;  %v1753_v60 = vpop.f32.mrb[15].mxu1 }
 0x44b   :  { %1476 = vrot.lane.b32.xlu1 %v1462_v57, %s1954_s5 }
 0x44c   :  { %1470 = vrot.lane.b32.xlu0 %v1461_v59, %s1945_s28 }
 0x44d   :  { %v1294_v63 = vpop.f32.mrb[16].mxu1  ;;  %v1370_v0 = vpop.f32.mrb[12].mxu0 }
 0x44e   :  { %v1463_v1 = vmul.f32 %v1839_v61, %v1294_v63  ;;  %v1464_v2 = vmul.f32 %v1841_v62, %v1370_v0  ;;  %v1763_v3 = vpop.f32.mrb[17].mxu1  ;;  %v1768_v4 = vpop.f32.mrb[13].mxu0 }
 0x450   :  { %1484 = vrot.lane.b32.xlu0 %v1464_v2, %s1955_s6  ;;  %1478 = vrot.lane.b32.xlu1 %v1463_v1, %s1954_s5 }
 0x451   :  { %v1446_v6 = vpop.f32.mrb[18].mxu1 }
 0x452   :  { %v1465_v7 = vmul.f32 %v1843_v5, %v1446_v6  ;;  %v1773_v9 = vpop.f32.mrb[19].mxu1 }
 0x454   :  { %1486 = vrot.lane.b32.xlu1 %v1465_v7, %s1955_s6 }
 0x4b9   :  { %v1469_v12 = vpop.permute.xlu1 %1468 }
 0x4ba   :  { %v1490_v18 = vsel %vm163_vm2, %v1458_v16, %v1469_v12 }
 0x4bd   :  { %v1477_v14 = vpop.permute.xlu1 %1476 }
 0x4be   :  { %v1471_v15 = vpop.permute.xlu0 %1470  ;;  %v1493_v19 = vsel %vm1492_vm3, %v1490_v18, %v1477_v14 }
 0x4bf   :  { %v1491_v24 = vsel %vm163_vm2, %v1459_v22, %v1471_v15 }
 0x4c2   :  { %v1479_v20 = vpop.permute.xlu1 %1478  ;;  %v1485_v21 = vpop.permute.xlu0 %1484 }
 0x4c3   :  { %v1496_v23 = vsel %vm1495_vm4, %v1493_v19, %v1485_v21  ;;  %v1494_v25 = vsel %vm1492_vm3, %v1491_v24, %v1479_v20 }
 0x4c4   :  { %1782 = vmatprep.mubr.msk.f32.mxu0 %vm65_vm0, %v1496_v23 }
 0x4c6   :  { %v1487_v26 = vpop.permute.xlu1 %1486 }
 0x4c7   :  { %v1497_v27 = vsel %vm1495_vm4, %v1494_v25, %v1487_v26 }
 0x4c8   :  { %1783 = vmatmul.mubr.msk.f32.vlgmr.msra.gmra.mrb[14].mxu0 %vm65_vm0, %v1497_v27 }
 0x59b   :  { %v1784_v29 = vpop.f32.mrb[14].mxu0 }
 0x59c   :  { %v1587_v30 = vadd.f32 %v1784_v29, %v1636_v28  ;;  %v1581_v31 = vpop.f32.mrb[15].mxu0 }
 0x59d   :  { %v1582_v32 = vadd.f32 %v1636_v28, %v1581_v31 }
 0x59e   :  { %1591 = vst.msk [vmem:[#allocation8 + $0x8] sm:$0xff] %vm65_vm0, %v1587_v30 }
 0x59f   :  { %1590 = vst.msk [vmem:[#allocation8] sm:$0xff] %vm65_vm0, %v1582_v32 }
 0x5a0   :  { %1925 = shalt.err (!%p1922_p0)
}
 0x5a1   :  { %s1926_s1 = scalar_lea.hbm %s2186_s4, 256 }
 0x5a2   :  { %p1927_p1 = scmp.ne.s32.totalorder %s2186_s4, %s1926_s1  ;;  %p1930_p2 = scmp.lt.u32.totalorder %s1926_s1, %s2186_s4 }
 0x5a4   :  { %p1932_p3 = pnand %p1930_p2, %p1927_p1 }
 0x5a6   :  { %1935 = shalt.err (!%p1932_p3)
}
 0x5a7   :  { %1603 = dma.vmem_to_hbm [thread:$0]  %s1598_s10, 256, %s2186_s4, [#allocation4], %s1944_s27, %s1944_s27, %s1945_s28  }
 0x5a8   :  { %1940 = dma.done.wait [#allocation4], 256  }
 0x5a9   :  { %1941 = vsyncadd [#allocation4], 4294967040 }
 0x5aa   :  { %1607 = vsyncpa [#allocation3], 1 }
 0x5ab   :  { %1608 = vsyncpa [#allocation6], 1 }
 0x5ac   :  { %1609 = vsyncpa [#allocation4], 1 }

</bundles_post_ra>
